<compile_context>
chip_gen: v6e
topology: v6e:2x2x1
jax: 0.10.0
libtpu: 0.0.40
codegen_flags: <defaults>
</compile_context>

<pallas_src>
import functools
import math

import jax
import jax.numpy as jnp
from jax.experimental import pallas as pl
from jax.experimental.pallas import tpu as pltpu


def _disc_kernel(x_ref, m_ref, w1t_ref, b1_ref, w2_ref, b2_ref,
                 p_ref, stats_ref, *, label):
    # x_ref: [H, TM] f32 -- tokens on the lane axis, so every op below is lane-dense.
    x = x_ref[...]

    # fc1 on the MXU: [HD, H] @ [H, TM] -> [HD, TM], + bias, ReLU.
    h = jnp.dot(w1t_ref[...], x, preferred_element_type=jnp.float32)
    h = jnp.maximum(h + b1_ref[...], 0.0)                     # [HD, TM]

    # fc2 as broadcast-multiply + sublane reduction (avoids a 1-wide MXU matmul).
    z = jnp.sum(w2_ref[...] * h, axis=0, keepdims=True) + b2_ref[0]   # [1, TM]

    p = 1.0 / (1.0 + jnp.exp(-z))                             # sigmoid, [1, TM]
    p_ref[...] = p                                            # lane-dense store

    m = m_ref[...]                                            # [1, TM] 0/1 float

    # label is a compile-time constant -> only one BCE branch is live.
    # The -100 clamp matches torch.nn.BCELoss's log clamp (load-bearing for p==0/1).
    if label == 0.0:
        log_term = jnp.maximum(jnp.log(1.0 - p), -100.0)
    else:
        log_term = jnp.maximum(jnp.log(p), -100.0)
    bce = -log_term
    correct = (jnp.round(p) == label).astype(jnp.float32)     # round half-to-even (torch)

    s_loss = jnp.sum(bce * m)
    s_correct = jnp.sum(correct * m)
    s_mask = jnp.sum(m)

    # Per-block partial sums broadcast across 128 lanes -> full-width slab store.
    # Reduced in the JAX glue; keeps the grid axis fully parallel (no carried state).
    stats_ref[...] = jnp.concatenate(
        [jnp.broadcast_to(s_loss, (1, 128)),
         jnp.broadcast_to(s_correct, (1, 128)),
         jnp.broadcast_to(s_mask, (1, 128))], axis=0)


def _choose_tm(n, target=2048):
    """Largest multiple of 128 that divides n and is <= target."""
    tm = min(n, target)
    while n % tm:
        tm -= 128
    return tm


def discriminator_forward(seqs, mask, W1, b1, W2, b2, fake=True, tm=None):
    B, T, H = seqs.shape
    HD = W1.shape[1]
    N = B * T
    assert N % 128 == 0, "B*T must be a multiple of 128 (torch logits.view(-1, 128))"
    if tm is None:
        tm = _choose_tm(N)
    assert tm % 128 == 0 and N % tm == 0
    G = N // tm

    # Token-major -> feature-major: tokens live on the lane axis.
    # TODO(synk): if the model tolerates it, keep seqs in bf16 in HBM and upcast
    # in-kernel to halve the dominant DMA stream; kept f32 here for exactness.
    x_t = seqs.astype(jnp.float32).reshape(N, H).T            # [H, N]
    m2 = mask.astype(jnp.float32).reshape(1, N)               # [1, N]
    W1t = W1.astype(jnp.float32).T                            # [HD, H]
    b1c = b1.astype(jnp.float32).reshape(HD, 1)               # [HD, 1]
    W2c = W2.astype(jnp.float32).reshape(HD, 1)               # [HD, 1]
    b2c = b2.astype(jnp.float32).reshape(1)                   # [1] -> SMEM scalar

    label = 0.0 if fake else 1.0
    kernel = functools.partial(_disc_kernel, label=label)

    probs, stats = pl.pallas_call(
        kernel,
        out_shape=(
            jax.ShapeDtypeStruct((1, N), jnp.float32),
            jax.ShapeDtypeStruct((3, 128 * G), jnp.float32),
        ),
        grid_spec=pltpu.PrefetchScalarGridSpec(
            num_scalar_prefetch=0,
            grid=(G,),
            in_specs=[
                pl.BlockSpec((H, tm), lambda i: (0, i)),      # x  [H, tm]
                pl.BlockSpec((1, tm), lambda i: (0, i)),      # mask [1, tm]
                pl.BlockSpec((HD, H), lambda i: (0, 0)),      # W1^T (resident)
                pl.BlockSpec((HD, 1), lambda i: (0, 0)),      # b1
                pl.BlockSpec((HD, 1), lambda i: (0, 0)),      # W2
                pl.BlockSpec(memory_space=pltpu.MemorySpace.SMEM),  # b2 scalar
            ],
            out_specs=[
                pl.BlockSpec((1, tm), lambda i: (0, i)),      # probs, lane-dense
                pl.BlockSpec((3, 128), lambda i: (0, i)),     # per-block stats
            ],
        ),
        compiler_params=pltpu.CompilerParams(
            dimension_semantics=("parallel",)),
    )(x_t, m2, W1t, b1c, W2c, b2c)

    # Reduce per-block partials (each block's 128 lanes hold the same value).
    s = stats.reshape(3, G, 128)[:, :, 0].sum(axis=1)
    loss = s[0] / s[2]
    acc = s[1] / s[2]

    p = probs.reshape(B, T, 1)
    confidences = jnp.concatenate([1.0 - p, p], axis=2)
    return loss, confidences, acc


def ref_forward(seqs, mask, W1, b1, W2, b2, fake=True):
    """Pure-JAX reference mirroring the torch module."""
    label = 0.0 if fake else 1.0
    h = jnp.maximum(seqs @ W1 + b1, 0.0)
    z = h @ W2 + b2
    p = 1.0 / (1.0 + jnp.exp(-z))                             # [B, T, 1]
    confidences = jnp.concatenate([1.0 - p, p], axis=2)
    m = mask.astype(jnp.float32)
    p2 = p[..., 0]
    log_p = jnp.maximum(jnp.log(p2), -100.0)
    log_1mp = jnp.maximum(jnp.log(1.0 - p2), -100.0)
    bce = -(label * log_p + (1.0 - label) * log_1mp)
    n = jnp.sum(m)
    loss = jnp.sum(bce * m) / n
    preds = jnp.round(p2)
    corrects = jnp.sum((preds == label).astype(jnp.float32) * m)
    return loss, confidences, corrects / n


if __name__ == "__main__":
    B, T = 2, 128          # T = 128 is implied by logits.view(-1, 128)
    INPUT_DIM, HIDDEN_DIM = 32, 32

    key = jax.random.PRNGKey(0)
    k_seq, k_mask, k1, k2, k3, k4 = jax.random.split(key, 6)

    seqs = jax.random.normal(k_seq, (B, T, INPUT_DIM), dtype=jnp.float32)
    mask = jax.random.bernoulli(k_mask, 0.7, (B, T))

    # Deterministic torch-Linear-style init: U(-1/sqrt(fan_in), 1/sqrt(fan_in)).
    bnd1 = 1.0 / math.sqrt(INPUT_DIM)
    W1 = jax.random.uniform(k1, (INPUT_DIM, HIDDEN_DIM), jnp.float32, -bnd1, bnd1)
    b1 = jax.random.uniform(k2, (HIDDEN_DIM,), jnp.float32, -bnd1, bnd1)
    bnd2 = 1.0 / math.sqrt(HIDDEN_DIM)
    W2 = jax.random.uniform(k3, (HIDDEN_DIM, 1), jnp.float32, -bnd2, bnd2)
    b2 = jax.random.uniform(k4, (1,), jnp.float32, -bnd2, bnd2)

    loss, conf, acc = discriminator_forward(seqs, mask, W1, b1, W2, b2, fake=True)
    jax.block_until_ready((loss, conf, acc))

    loss_r, conf_r, acc_r = ref_forward(seqs, mask, W1, b1, W2, b2, fake=True)
    assert abs(float(loss) - float(loss_r)) < 1e-4, (loss, loss_r)
    assert abs(float(acc) - float(acc_r)) < 1e-6, (acc, acc_r)
    assert float(jnp.max(jnp.abs(conf - conf_r))) < 1e-5

    print("KERNEL_OK")
</pallas_src>

<mosaic_0001>
module attributes {stable_mosaic.version = 11 : i64} {
  func.func @_disc_kernel(%arg0: i32, %arg1: memref<32x256xf32, #tpu.memory_space<vmem>>, %arg2: memref<1x256xf32, #tpu.memory_space<vmem>>, %arg3: memref<32x32xf32, #tpu.memory_space<vmem>>, %arg4: memref<32x1xf32, #tpu.memory_space<vmem>>, %arg5: memref<32x1xf32, #tpu.memory_space<vmem>>, %arg6: memref<1xf32, #tpu.memory_space<smem>>, %arg7: memref<1x256xf32, #tpu.memory_space<vmem>>, %arg8: memref<3x128xf32, #tpu.memory_space<vmem>>) attributes {dimension_semantics = [#tpu.dimension_semantics<parallel>], iteration_bounds = array<i64: 1>, scalar_prefetch = 0 : i64, scratch_operands = 0 : i64, tpu.core_type = #tpu.core_type<tc>, window_params = [{transform_indices = @transform_0, window_bounds = array<i64: 32, 256>}, {transform_indices = @transform_1, window_bounds = array<i64: 1, 256>}, {pipeline_mode = #tpu.pipeline_mode<synchronous>, transform_indices = @transform_2, window_bounds = array<i64: 32, 32>}, {pipeline_mode = #tpu.pipeline_mode<synchronous>, transform_indices = @transform_3, window_bounds = array<i64: 32, 1>}, {pipeline_mode = #tpu.pipeline_mode<synchronous>, transform_indices = @transform_4, window_bounds = array<i64: 32, 1>}, {transform_indices = @transform_5, window_bounds = array<i64: 1>}, {transform_indices = @transform_6, window_bounds = array<i64: 1, 256>}, {transform_indices = @transform_7, window_bounds = array<i64: 3, 128>}]} {
    %c0 = arith.constant 0 : index
    %c0_0 = arith.constant 0 : index
    %0 = vector.load %arg1[%c0, %c0_0] : memref<32x256xf32, #tpu.memory_space<vmem>>, vector<32x256xf32>
    %c0_1 = arith.constant 0 : index
    %c0_2 = arith.constant 0 : index
    %1 = vector.load %arg3[%c0_1, %c0_2] : memref<32x32xf32, #tpu.memory_space<vmem>>, vector<32x32xf32>
    %cst = arith.constant dense<0.000000e+00> : vector<32x256xf32>
    %2 = tpu.matmul %1, %0, %cst {dimension_numbers = #tpu.dot_dimension_numbers<[1], [0], [0], [1], [0, 0, 1, 1], [], []>} : vector<32x32xf32>, vector<32x256xf32>, vector<32x256xf32> -> vector<32x256xf32>
    %c0_3 = arith.constant 0 : index
    %c0_4 = arith.constant 0 : index
    %3 = vector.load %arg4[%c0_3, %c0_4] : memref<32x1xf32, #tpu.memory_space<vmem>>, vector<32x1xf32>
    %4 = vector.broadcast %3 : vector<32x1xf32> to vector<32x256xf32>
    %5 = arith.addf %2, %4 : vector<32x256xf32>
    %cst_5 = arith.constant 0.000000e+00 : f32
    %6 = vector.broadcast %cst_5 : f32 to vector<32x256xf32>
    %7 = arith.maximumf %5, %6 : vector<32x256xf32>
    %c0_6 = arith.constant 0 : index
    %c0_7 = arith.constant 0 : index
    %8 = vector.load %arg5[%c0_6, %c0_7] : memref<32x1xf32, #tpu.memory_space<vmem>>, vector<32x1xf32>
    %9 = vector.broadcast %8 : vector<32x1xf32> to vector<32x256xf32>
    %10 = arith.mulf %9, %7 : vector<32x256xf32>
    %cst_8 = arith.constant dense<0.000000e+00> : vector<256xf32>
    %11 = vector.multi_reduction <add>, %10, %cst_8 [0] : vector<32x256xf32> to vector<256xf32>
    %12 = vector.shape_cast %11 : vector<256xf32> to vector<1x256xf32>
    %c0_9 = arith.constant 0 : index
    %13 = memref.load %arg6[%c0_9] : memref<1xf32, #tpu.memory_space<smem>>
    %14 = vector.broadcast %13 : f32 to vector<1x256xf32>
    %15 = arith.addf %12, %14 : vector<1x256xf32>
    %cst_10 = arith.constant 0.000000e+00 : f32
    %16 = vector.broadcast %cst_10 : f32 to vector<1x256xf32>
    %17 = arith.subf %16, %15 : vector<1x256xf32>
    %18 = math.exp %17 : vector<1x256xf32>
    %cst_11 = arith.constant 1.000000e+00 : f32
    %19 = vector.broadcast %cst_11 : f32 to vector<1x256xf32>
    %20 = arith.addf %19, %18 : vector<1x256xf32>
    %cst_12 = arith.constant 1.000000e+00 : f32
    %21 = vector.broadcast %cst_12 : f32 to vector<1x256xf32>
    %22 = arith.divf %21, %20 : vector<1x256xf32>
    %c0_13 = arith.constant 0 : index
    %c0_14 = arith.constant 0 : index
    %23 = vector.load %arg7[%c0_13, %c0_14] : memref<1x256xf32, #tpu.memory_space<vmem>>, vector<1x256xf32>
    tpu.vector_store %arg7[%c0_13, %c0_14], %22 {strides = array<i32>} : memref<1x256xf32, #tpu.memory_space<vmem>>, vector<1x256xf32>,
    %c0_15 = arith.constant 0 : index
    %c0_16 = arith.constant 0 : index
    %24 = vector.load %arg2[%c0_15, %c0_16] : memref<1x256xf32, #tpu.memory_space<vmem>>, vector<1x256xf32>
    %cst_17 = arith.constant 1.000000e+00 : f32
    %25 = vector.broadcast %cst_17 : f32 to vector<1x256xf32>
    %26 = arith.subf %25, %22 : vector<1x256xf32>
    %27 = math.log %26 : vector<1x256xf32>
    %cst_18 = arith.constant -1.000000e+02 : f32
    %28 = vector.broadcast %cst_18 : f32 to vector<1x256xf32>
    %29 = arith.maximumf %27, %28 : vector<1x256xf32>
    %cst_19 = arith.constant 0.000000e+00 : f32
    %30 = vector.broadcast %cst_19 : f32 to vector<1x256xf32>
    %31 = arith.subf %30, %29 : vector<1x256xf32>
    %32 = math.roundeven %22 : vector<1x256xf32>
    %cst_20 = arith.constant 0.000000e+00 : f32
    %33 = vector.broadcast %cst_20 : f32 to vector<1x256xf32>
    %34 = arith.cmpf oeq, %32, %33 : vector<1x256xf32>
    %35 = arith.extui %34 : vector<1x256xi1> to vector<1x256xi32>
    %36 = arith.sitofp %35 : vector<1x256xi32> to vector<1x256xf32>
    %37 = arith.mulf %31, %24 : vector<1x256xf32>
    %38 = vector.shape_cast %37 : vector<1x256xf32> to vector<1x1x256xf32>
    %cst_21 = arith.constant dense<0.000000e+00> : vector<1xf32>
    %39 = vector.multi_reduction <add>, %38, %cst_21 [1, 2] : vector<1x1x256xf32> to vector<1xf32>
    %40 = vector.shape_cast %39 : vector<1xf32> to vector<1x1x1xf32>
    %41 = vector.extract %40[0, 0, 0] : f32 from vector<1x1x1xf32>
    %42 = arith.mulf %36, %24 : vector<1x256xf32>
    %43 = vector.shape_cast %42 : vector<1x256xf32> to vector<1x1x256xf32>
    %cst_22 = arith.constant dense<0.000000e+00> : vector<1xf32>
    %44 = vector.multi_reduction <add>, %43, %cst_22 [1, 2] : vector<1x1x256xf32> to vector<1xf32>
    %45 = vector.shape_cast %44 : vector<1xf32> to vector<1x1x1xf32>
    %46 = vector.extract %45[0, 0, 0] : f32 from vector<1x1x1xf32>
    %47 = vector.shape_cast %24 : vector<1x256xf32> to vector<1x1x256xf32>
    %cst_23 = arith.constant dense<0.000000e+00> : vector<1xf32>
    %48 = vector.multi_reduction <add>, %47, %cst_23 [1, 2] : vector<1x1x256xf32> to vector<1xf32>
    %49 = vector.shape_cast %48 : vector<1xf32> to vector<1x1x1xf32>
    %50 = vector.extract %49[0, 0, 0] : f32 from vector<1x1x1xf32>
    %51 = vector.broadcast %41 : f32 to vector<1x128xf32>
    %52 = vector.broadcast %46 : f32 to vector<1x128xf32>
    %53 = vector.broadcast %50 : f32 to vector<1x128xf32>
    %54 = tpu.concatenate %51, %52, %53 in 0 : vector<1x128xf32>, vector<1x128xf32>, vector<1x128xf32> -> vector<3x128xf32>
    %c0_24 = arith.constant 0 : index
    %c0_25 = arith.constant 0 : index
    %55 = vector.load %arg8[%c0_24, %c0_25] : memref<3x128xf32, #tpu.memory_space<vmem>>, vector<3x128xf32>
    tpu.vector_store %arg8[%c0_24, %c0_25], %54 {strides = array<i32>} : memref<3x128xf32, #tpu.memory_space<vmem>>, vector<3x128xf32>,
    return
  }
  func.func @transform_0(%arg0: i32) -> (i32, i32) {
    %c0_i32 = arith.constant 0 : i32
    %c0_i32_0 = arith.constant 0 : i32
    return %c0_i32, %arg0 : i32, i32
  }
  func.func @transform_1(%arg0: i32) -> (i32, i32) {
    %c0_i32 = arith.constant 0 : i32
    %c0_i32_0 = arith.constant 0 : i32
    return %c0_i32, %arg0 : i32, i32
  }
  func.func @transform_2(%arg0: i32) -> (i32, i32) {
    %c0_i32 = arith.constant 0 : i32
    %c0_i32_0 = arith.constant 0 : i32
    %c0_i32_1 = arith.constant 0 : i32
    return %c0_i32, %c0_i32_0 : i32, i32
  }
  func.func @transform_3(%arg0: i32) -> (i32, i32) {
    %c0_i32 = arith.constant 0 : i32
    %c0_i32_0 = arith.constant 0 : i32
    %c0_i32_1 = arith.constant 0 : i32
    return %c0_i32, %c0_i32_0 : i32, i32
  }
  func.func @transform_4(%arg0: i32) -> (i32, i32) {
    %c0_i32 = arith.constant 0 : i32
    %c0_i32_0 = arith.constant 0 : i32
    %c0_i32_1 = arith.constant 0 : i32
    return %c0_i32, %c0_i32_0 : i32, i32
  }
  func.func @transform_5(%arg0: i32) -> i32 {
    %c0_i32 = arith.constant 0 : i32
    %c0_i32_0 = arith.constant 0 : i32
    return %c0_i32 : i32
  }
  func.func @transform_6(%arg0: i32) -> (i32, i32) {
    %c0_i32 = arith.constant 0 : i32
    %c0_i32_0 = arith.constant 0 : i32
    return %c0_i32, %arg0 : i32, i32
  }
  func.func @transform_7(%arg0: i32) -> (i32, i32) {
    %c0_i32 = arith.constant 0 : i32
    %c0_i32_0 = arith.constant 0 : i32
    return %c0_i32, %arg0 : i32, i32
  }
}

</mosaic_0001>

<bundles_post_ra>
// kernel: tpu_custom_call.1
= control target key start
LH: loop header
LB: loop body
LE: loop exit
PB: predicated region body
PF: predicated region fallthrough
CT: control target
= control target key end

     0   :  { %14 = vsyncpa [#allocation4], 0  ;;  %s636_s0 = inlined_call_operand.vmem [shape: f32[32,256], index: 0, kind: input, shape index: {}]   ;;  %s637_s1 = inlined_call_operand.vmem [shape: f32[1,256], index: 1, kind: input, shape index: {}]   ;;  %s638_s2 = inlined_call_operand.hbm [shape: f32[32,32], index: 2, kind: input, shape index: {}]   ;;  %s639_s3 = inlined_call_operand.vmem [shape: f32[32,1], index: 3, kind: input, shape index: {}]   ;;  %s640_s4 = inlined_call_operand.vmem [shape: f32[32,1], index: 4, kind: input, shape index: {}]   ;;  %s641_s5 = inlined_call_operand.<no memory space> [shape: f32[1], index: 5, kind: input, shape index: {}]   ;;  %s642_s6 = inlined_call_operand.hbm [shape: f32[1,256], index: 6, kind: output, shape index: {0}]   ;;  %s643_s7 = inlined_call_operand.hbm [shape: f32[3,128], index: 7, kind: output, shape index: {1}]  }
   0x1   :  { %15 = vsyncpa [#allocation5], 0 }
   0x2   :  { %16 = vsyncpa [#allocation8], 0  ;;  %s508_s24 = smov [#allocation3]  }
   0x3   :  { %s26_s25 = sshll.u32 %s508_s24, 4  ;;  %s27_s25 = int_to_ptr.vmem [resolvable:$true] %s26_s25 }
   0x4   :  { %s450_s26 = scalar_lea.vmem %s27_s25, 512  ;;  %p455_p1 = scmp.lt.s32.totalorder %s27_s25, %s27_s25 }
   0x5   :  { %p451_p0 = scmp.ne.s32.totalorder %s27_s25, %s450_s26  ;;  %p456_p2 = scmp.lt.s32.totalorder %s450_s26, %s450_s26 }
   0x7   :  { %p457_p3 = por %p456_p2, %p455_p1 }
   0x9   :  { %p458_p4 = pnand %p457_p3, %p451_p0 }
   0xb   :  { %461 = shalt.err (!%p458_p4)
}
   0xc   :  { %s509_s27 = smov 128   ;;  %s510_s28 = smov 8  }
   0xd   :  { %32 = dma.hbm_to_vmem [thread:$0]  %s638_s2, 512, %s27_s25, [#allocation4], %s509_s27, %s509_s27, %s510_s28  }
   0xe   :  { %502 = dma.done.wait [#allocation4], 512  }
   0xf   :  { %503 = vsyncadd [#allocation4], 4294966784  ;;  %v511_v0 = vmov 0.0   ;;  %v512_v1 = vmov 0   ;;  %v49_v2 = vld [vmem:[%s636_s0 + $0x38] sm:$0xff]  ;;  %v48_v3 = vld [vmem:[%s636_s0 + $0x30] sm:$0xff] }
  0x10   :  { %155 = vmatprep.mubr.f32.mxu0 %v511_v0  ;;  %167 = vmatprep.mubr.f32.mxu1 %v511_v0  ;;  %v47_v4 = vld [vmem:[%s636_s0 + $0x28] sm:$0xff]  ;;  %v46_v5 = vld [vmem:[%s636_s0 + $0x20] sm:$0xff]  ;;  %v45_v6 = vld [vmem:[%s636_s0 + $0x18] sm:$0xff]  ;;  %vm78_vm0 = vcmask 261120   ;;  %vm309_vm6 = vcmask 1040384  }
  0x11   :  { %428 = vset.pattern.permute.xlu0 %v512_v1  ;;  %429 = vset.pattern.permute.xlu1 %v512_v1  ;;  %v44_v7 = vld [vmem:[%s636_s0 + $0x10] sm:$0xff]  ;;  %v43_v8 = vld [vmem:[%s636_s0 + $0x8] sm:$0xff]  ;;  %v42_v9 = vld [vmem:[%s636_s0] sm:$0xff] }
  0x12   :  { %115 = vmatprep.subr.mxu0 %v49_v2  ;;  %390 = vmatprep.subr.mxu1 %v49_v2  ;;  %v50_v10 = vld [vmem:[#allocation3] sm:$0xff]  ;;  %v52_v11 = vld [vmem:[#allocation3 + $0x10] sm:$0xff]  ;;  %v51_v14 = vld [vmem:[#allocation3 + $0x8] sm:$0xff] }
  0x13   :  { %116 = vmatpush1.msra.mxu0 %v48_v3  ;;  %394 = vmatpush1.msra.mxu1 %v48_v3  ;;  %v54_v12 = vld [vmem:[%s639_s3] sm:$0xff]  ;;  %v56_v13 = vld [vmem:[%s639_s3 + $0x10] sm:$0xff]  ;;  %v53_v15 = vld [vmem:[#allocation3 + $0x18] sm:$0xff] }
  0x14   :  { %117 = vmatprep.subr.mxu0 %v47_v4  ;;  %391 = vmatprep.subr.mxu1 %v47_v4  ;;  %v55_v16 = vld [vmem:[%s639_s3 + $0x8] sm:$0xff]  ;;  %v57_v17 = vld [vmem:[%s639_s3 + $0x18] sm:$0xff]  ;;  %v188_v18 = vld [vmem:[%s640_s4] sm:$0xff] }
  0x15   :  { %118 = vmatpush1.msra.mxu0 %v46_v5  ;;  %395 = vmatpush1.msra.mxu1 %v46_v5  ;;  %v189_v19 = vld [vmem:[%s640_s4 + $0x8] sm:$0xff]  ;;  %v190_v20 = vld [vmem:[%s640_s4 + $0x10] sm:$0xff]  ;;  %v191_v21 = vld [vmem:[%s640_s4 + $0x18] sm:$0xff] }
  0x16   :  { %119 = vmatprep.subr.mxu0 %v45_v6  ;;  %392 = vmatprep.subr.mxu1 %v45_v6 }
  0x17   :  { %120 = vmatpush1.msra.mxu0 %v44_v7  ;;  %396 = vmatpush1.msra.mxu1 %v44_v7 }
  0x18   :  { %121 = vmatprep.subr.mxu0 %v43_v8  ;;  %393 = vmatprep.subr.mxu1 %v43_v8 }
  0x19   :  { %122 = vmatpush1.msra.mxu0 %v42_v9  ;;  %397 = vmatpush1.msra.mxu1 %v42_v9 }
  0x1a   :  { %384 = vmatmul.mubr.msk.f32.vlgmr.msra.gmra.mxu0 %vm78_vm0, %v50_v10  ;;  %386 = vmatmul.mubr.msk.f32.vlgmr.msra.gmra.mxu1 %vm78_vm0, %v52_v11 }
  0x1b   :  { %161 = vmatprep.mubr.f32.mxu0 %v511_v0  ;;  %173 = vmatprep.mubr.f32.mxu1 %v511_v0 }
  0x1c   :  { %60 = vperm.xlu0 %428, %v54_v12   ;;  %70 = vperm.xlu1 %429, %v56_v13  }
  0x1e   :  { %385 = vmatmul.mubr.msk.f32.gmra.mxu0 %vm78_vm0, %v51_v14  ;;  %387 = vmatmul.mubr.msk.f32.gmra.mxu1 %vm78_vm0, %v53_v15  ;;  %v239_v14 = vstv %s641_s5 }
  0x20   :  { %65 = vperm.xlu0 %428, %v55_v16   ;;  %75 = vperm.xlu1 %429, %v57_v17  }
  0x24   :  { %194 = vperm.xlu0 %428, %v188_v18   ;;  %199 = vperm.xlu1 %429, %v189_v19  }
  0x28   :  { %204 = vperm.xlu0 %428, %v190_v20   ;;  %209 = vperm.xlu1 %429, %v191_v21  }
  0x97   :  { %v61_v22 = vpop.permute.xlu0 %60  ;;  %v71_v23 = vpop.permute.xlu1 %70 }
  0x9b   :  { %v66_v24 = vpop.permute.xlu0 %65  ;;  %v76_v27 = vpop.permute.xlu1 %75 }
  0x9f   :  { %v195_v35 = vpop.permute.xlu0 %194  ;;  %v200_v42 = vpop.permute.xlu1 %199 }
  0xa3   :  { %v205_v53 = vpop.permute.xlu0 %204  ;;  %v210_v59 = vpop.permute.xlu1 %209 }
  0xda   :  { %v157_v25 = vpop.f32.mrf.mxu0  ;;  %v169_v26 = vpop.f32.mrf.mxu1 }
  0xdb   :  { %v158_v28 = vadd.f32 %v157_v25, %v61_v22  ;;  %v170_v32 = vadd.f32 %v169_v26, %v71_v23 }
  0xdc   :  { %v159_v29 = vpop.f32.mrf.mxu0  ;;  %v171_v30 = vpop.f32.mrf.mxu1 }
  0xdd   :  { %v160_v31 = vadd.f32 %v159_v29, %v61_v22  ;;  %v172_v36 = vadd.f32 %v171_v30, %v71_v23  ;;  %v180_v37 = vmax.f32 %v158_v28, 0.0  ;;  %v184_v46 = vmax.f32 %v170_v32, 0.0 }
  0xde   :  { %v163_v33 = vpop.f32.mrf.mxu0  ;;  %v175_v34 = vpop.f32.mrf.mxu1  ;;  %v260_v28 = vlaneseq  ;;  %v513_v29 = vmov 1966171168  }
  0xdf   :  { %v164_v38 = vadd.f32 %v163_v33, %v66_v24  ;;  %v176_v39 = vadd.f32 %v175_v34, %v76_v27  ;;  %v181_v43 = vmax.f32 %v160_v31, 0.0  ;;  %v185_v48 = vmax.f32 %v172_v36, 0.0 }
  0xe0   :  { %v165_v40 = vpop.f32.mrf.mxu0  ;;  %v177_v41 = vpop.f32.mrf.mxu1  ;;  %v212_v50 = vmul.f32 %v195_v35, %v180_v37  ;;  %v216_v57 = vmul.f32 %v205_v53, %v184_v46  ;;  %v258_v30 = vunpack.c.l.s4 %v513_v29  ;;  %v261_v31 = vshrl.u32 %v260_v28, 7 }
  0xe1   :  { %v166_v44 = vadd.f32 %v165_v40, %v66_v24  ;;  %v178_v45 = vadd.f32 %v177_v41, %v76_v27  ;;  %v182_v47 = vmax.f32 %v164_v38, 0.0  ;;  %v186_v52 = vmax.f32 %v176_v39, 0.0 }
  0xe2   :  { %v213_v54 = vmul.f32 %v195_v35, %v181_v43  ;;  %v217_v60 = vmul.f32 %v205_v53, %v185_v48  ;;  %v259_v32 = vunpack.c.0.s8 %v258_v30  ;;  %v299_v41 = vsub.s32 0, %v261_v31  ;;  %v277_v43 = vld [vmem:[%s637_s1] sm:$0x3]  ;;  %s514_s1 = smov [#allocation6]  }
  0xe3   :  { %v183_v49 = vmax.f32 %v166_v44, 0.0  ;;  %v214_v51 = vmul.f32 %v200_v42, %v182_v47  ;;  %v187_v56 = vmax.f32 %v178_v45, 0.0  ;;  %v218_v62 = vmul.f32 %v210_v59, %v186_v52  ;;  %s361_s15 = sshll.u32 %s514_s1, 4  ;;  %s362_s15 = int_to_ptr.vmem [resolvable:$true] %s361_s15 }
  0xe4   :  { %v262_v37 = vsub.s32 %v259_v32, %v261_v31  ;;  %v303_v46 = vsub.s32 1, %v261_v31  ;;  %vm274_vm1 = vcmp.lt.s32.totalorder %v260_v28, 256  ;;  %s462_s16 = scalar_lea.vmem %s362_s15, 32  ;;  %p467_p6 = scmp.lt.s32.totalorder %s362_s15, %s362_s15 }
  0xe5   :  { %v215_v55 = vmul.f32 %v200_v42, %v183_v49  ;;  %v220_v58 = vadd.f32 %v214_v51, %v212_v50  ;;  %v219_v1 = vmul.f32 %v210_v59, %v187_v56  ;;  %v300_v56 = vrot.slane %v277_v43, %v299_v41  ;;  %p463_p5 = scmp.ne.s32.totalorder %s362_s15, %s462_s16  ;;  %p468_p7 = scmp.lt.s32.totalorder %s462_s16, %s462_s16 }
  0xe7   :  { %v229_v61 = vadd.f32 %v215_v55, %v213_v54  ;;  %v221_v63 = vadd.f32 %v220_v58, %v216_v57  ;;  %v304_v58 = vrot.slane %v277_v43, %v303_v46  ;;  %p469_p8 = por %p468_p7, %p467_p6 }
  0xe9   :  { %v230_v2 = vadd.f32 %v229_v61, %v217_v60  ;;  %v222_v3 = vadd.f32 %v221_v63, %v218_v62  ;;  %p470_p9 = pnand %p469_p8, %p463_p5 }
  0xeb   :  { %v231_v4 = vadd.f32 %v230_v2, %v219_v1  ;;  %v223_v5 = vrot.slane %v222_v3, 4 }
  0xed   :  { %v232_v6 = vrot.slane %v231_v4, 4  ;;  %v224_v7 = vadd.f32 %v223_v5, %v222_v3 }
  0xef   :  { %v233_v8 = vadd.f32 %v232_v6, %v231_v4  ;;  %v225_v9 = vrot.slane %v224_v7, 2 }
  0xf1   :  { %v234_v10 = vrot.slane %v233_v8, 2  ;;  %v226_v11 = vadd.f32 %v225_v9, %v224_v7 }
  0xf3   :  { %v235_v12 = vadd.f32 %v234_v10, %v233_v8  ;;  %v227_v13 = vrot.slane %v226_v11, 1 }
  0xf5   :  { %v236_v15 = vrot.slane %v235_v12, 1  ;;  %v228_v16 = vadd.f32 %v227_v13, %v226_v11 }
  0xf7   :  { %v237_v17 = vadd.f32 %v236_v15, %v235_v12  ;;  %v240_v18 = vadd.f32 %v239_v14, %v228_v16  ;;  %v336_v15 = vsel %vm309_vm6, %v300_v56, 0.0  ;;  %v337_v16 = vsel %vm309_vm6, %v304_v58, 0.0 }
  0xf9   :  { %v241_v19 = vadd.f32 %v239_v14, %v237_v17  ;;  %v242_v20 = vsub.f32 0.0, %v240_v18  ;;  %v338_v18 = vadd.f32 %v337_v16, %v336_v15 }
  0xfb   :  { %v243_v21 = vsub.f32 0.0, %v241_v19  ;;  %v244_v22 = vmul.f32 1.442695, %v242_v20 }
  0xfd   :  { %v246_v23 = vmul.f32 1.442695, %v243_v21  ;;  %430 = vpow2.f32 %v244_v22 }
  0xff   :  { %432 = vpow2.f32 %v246_v23 }
 0x10a   :  { %v431_v24 = vpop.eup %430 }
 0x10b   :  { %v248_v26 = vadd.f32 1.0, %v431_v24 }
 0x10c   :  { %v433_v25 = vpop.eup %432 }
 0x10d   :  { %v249_v27 = vadd.f32 1.0, %v433_v25  ;;  %434 = vrcp.f32 %v248_v26 }
 0x10f   :  { %436 = vrcp.f32 %v249_v27 }
 0x11a   :  { %v435_v33 = vpop.eup %434 }
 0x11b   :  { %v400_v35 = vcvt.f32.s32 %v435_v33  ;;  %v278_v36 = vsub.f32 1.0, %v435_v33  ;;  %v398_v44 = vand.u32 2147483647, %v435_v33  ;;  %v403_v48 = vand.u32 2147483648, %v435_v33 }
 0x11c   :  { %v437_v34 = vpop.eup %436 }
 0x11d   :  { %v408_v38 = vcvt.f32.s32 %v437_v34  ;;  %v279_v39 = vsub.f32 1.0, %v437_v34  ;;  %v401_v40 = vcvt.s32.f32 %v400_v35  ;;  %438 = vlog2.f32 %v278_v36 }
 0x11e   :  { %v256_v42 = vcombine.low %v435_v33, %v437_v34  ;;  %v406_v49 = vand.u32 2147483647, %v437_v34  ;;  %v411_v52 = vand.u32 2147483648, %v437_v34  ;;  %vm399_vm2 = vcmp.lt.f32.partialorder %v398_v44, 8388608.0 }
 0x11f   :  { %v409_v45 = vcvt.s32.f32 %v408_v38  ;;  %440 = vlog2.f32 %v279_v39  ;;  %v402_v47 = vand.u32 2147483647, %v401_v40 }
 0x120   :  { %v263_v50 = vrot.slane %v256_v42, %v262_v37  ;;  %vm407_vm3 = vcmp.lt.f32.partialorder %v406_v49, 8388608.0 }
 0x121   :  { %v410_v51 = vand.u32 2147483647, %v409_v45  ;;  %v404_v53 = vor.u32 %v403_v48, %v402_v47 }
 0x122   :  { %v270_v54 = vrot.slane %v263_v50, %v262_v37 }
 0x123   :  { %v412_v55 = vor.u32 %v411_v52, %v410_v51  ;;  %v405_v57 = vsel %vm399_vm2, %v404_v53, %v435_v33 }
 0x124   :  { %276 = vst.msk [vmem:[#allocation6] sm:$0x3] %vm274_vm1, %v270_v54  ;;  %vm290_vm4 = vcmp.eq.f32.partialorder %v405_v57, 0.0 }
 0x125   :  { %v413_v59 = vsel %vm407_vm3, %v412_v55, %v437_v34  ;;  %v388_v60 = vsel %vm290_vm4, 1.0, %v511_v0 }
 0x126   :  { %vm291_vm5 = vcmp.eq.f32.partialorder %v413_v59, 0.0  ;;  %v322_v62 = vmul.f32 %v388_v60, %v300_v56 }
 0x127   :  { %v389_v61 = vsel %vm291_vm5, 1.0, %v511_v0 }
 0x128   :  { %v323_v63 = vmul.f32 %v389_v61, %v304_v58  ;;  %v324_v1 = vsel %vm309_vm6, %v322_v62, 0.0 }
 0x12a   :  { %v325_v2 = vsel %vm309_vm6, %v323_v63, 0.0  ;;  %v439_v3 = vpop.eup %438 }
 0x12b   :  { %v326_v4 = vadd.f32 %v325_v2, %v324_v1  ;;  %v281_v6 = vmul.f32 0.6931472, %v439_v3 }
 0x12c   :  { %v441_v5 = vpop.eup %440 }
 0x12d   :  { %327 = vadd.xlane.f32.xlu1 %v326_v4  ;;  %v283_v7 = vmul.f32 0.6931472, %v441_v5  ;;  %v284_v8 = vmax.f32 %v281_v6, -100.0 }
 0x12f   :  { %v285_v9 = vmax.f32 %v283_v7, -100.0  ;;  %v286_v10 = vsub.f32 0.0, %v284_v8 }
 0x131   :  { %v287_v11 = vsub.f32 0.0, %v285_v9  ;;  %v307_v12 = vmul.f32 %v300_v56, %v286_v10 }
 0x133   :  { %v308_v13 = vmul.f32 %v304_v58, %v287_v11  ;;  %v310_v0 = vsel %vm309_vm6, %v307_v12, 0.0 }
 0x135   :  { %v311_v14 = vsel %vm309_vm6, %v308_v13, 0.0 }
 0x136   :  { %v312_v17 = vadd.f32 %v311_v14, %v310_v0 }
 0x138   :  { %313 = vadd.xlane.f32.xlu0 %v312_v17 }
 0x13c   :  { %339 = vadd.xlane.f32.xlu0 %v338_v18 }
 0x13d   :  { %473 = shalt.err (!%p470_p9)
}
 0x13e   :  { %364 = dma.vmem_to_hbm [thread:$0]  %s362_s15, 32, %s642_s6, [#allocation5]   ;;  %vm352_vm7 = vcmask 1041408  }
 0x13f   :  { %s515_s20 = smov [#allocation7]  }
 0x140   :  { %s371_s21 = sshll.u32 %s515_s20, 4  ;;  %s372_s21 = int_to_ptr.vmem [resolvable:$true] %s371_s21 }
 0x141   :  { %s482_s23 = scalar_lea.vmem %s372_s21, 64  ;;  %p487_p11 = scmp.lt.s32.totalorder %s372_s21, %s372_s21 }
 0x142   :  { %p483_p10 = scmp.ne.s32.totalorder %s372_s21, %s482_s23  ;;  %p488_p12 = scmp.lt.s32.totalorder %s482_s23, %s482_s23 }
 0x144   :  { %p489_p13 = por %p488_p12, %p487_p11 }
 0x146   :  { %p490_p0 = pnand %p489_p13, %p483_p10 }
 0x1b6   :  { %v328_v19 = vpop.xlane.xlu1 %327 }
 0x1b7   :  { %v329_v20 = vrot.slane %v328_v19, 4 }
 0x1b9   :  { %v330_v21 = vadd.f32 %v329_v20, %v328_v19 }
 0x1bb   :  { %v331_v22 = vrot.slane %v330_v21, 2 }
 0x1bd   :  { %v332_v26 = vadd.f32 %v331_v22, %v330_v21 }
 0x1bf   :  { %v333_v32 = vrot.slane %v332_v26, 1 }
 0x1c1   :  { %v314_v23 = vpop.xlane.xlu0 %313  ;;  %v334_v37 = vadd.f32 %v333_v32, %v332_v26 }
 0x1c2   :  { %v315_v24 = vrot.slane %v314_v23, 4 }
 0x1c4   :  { %v316_v25 = vadd.f32 %v315_v24, %v314_v23 }
 0x1c5   :  { %v340_v27 = vpop.xlane.xlu0 %339 }
 0x1c6   :  { %v317_v28 = vrot.slane %v316_v25, 2  ;;  %v341_v29 = vrot.slane %v340_v27, 4 }
 0x1c8   :  { %v342_v30 = vadd.f32 %v341_v29, %v340_v27  ;;  %v318_v31 = vadd.f32 %v317_v28, %v316_v25 }
 0x1ca   :  { %v343_v33 = vrot.slane %v342_v30, 2  ;;  %v319_v34 = vrot.slane %v318_v31, 1 }
 0x1cc   :  { %v344_v35 = vadd.f32 %v343_v33, %v342_v30  ;;  %v320_v36 = vadd.f32 %v319_v34, %v318_v31 }
 0x1ce   :  { %414 = vpush %v320_v36  ;;  %v345_v38 = vrot.slane %v344_v35, 1 }
 0x1cf   :  { %416 = vpush %v334_v37 }
 0x1d0   :  { %v346_v39 = vadd.f32 %v345_v38, %v344_v35 }
 0x1d2   :  { %418 = vpush %v346_v39 }
 0x1ff   :  { %s415_s6 = spop %414 }
 0x200   :  { %s417_s19 = spop %416  ;;  %v348_v40 = vstv %s415_s6 }
 0x201   :  { %v349_v41 = vstv %s417_s19 }
 0x202   :  { %v351_v42 = vsel %vm309_vm6, %v348_v40, %v349_v41 }
 0x203   :  { %s419_s22 = spop %418 }
 0x204   :  { %v350_v43 = vstv %s419_s22 }
 0x205   :  { %v353_v44 = vsel %vm352_vm7, %v351_v42, %v350_v43 }
 0x206   :  { %354 = vst [vmem:[#allocation7] sm:$0x7] %v353_v44 }
 0x207   :  { %493 = shalt.err (!%p490_p0)
}
 0x208   :  { %374 = dma.vmem_to_hbm [thread:$0]  %s372_s21, 64, %s643_s7, [#allocation8]  }
 0x209   :  { %504 = dma.done.wait [#allocation5], 32  }
 0x20a   :  { %505 = vsyncadd [#allocation5], 4294967264 }
 0x20b   :  { %506 = dma.done.wait [#allocation8], 64  }
 0x20c   :  { %507 = vsyncadd [#allocation8], 4294967232 }
 0x20d   :  { %381 = vsyncpa [#allocation4], 1 }
 0x20e   :  { %382 = vsyncpa [#allocation5], 1 }
 0x20f   :  { %383 = vsyncpa [#allocation8], 1 }

</bundles_post_ra>
